<compile_context>
chip_gen: v7x
topology: tpu7x:2x2x1
jax: 0.10.0
libtpu: 0.0.40
codegen_flags: <defaults>
</compile_context>

<pallas_src>
import jax
import jax.numpy as jnp
from jax.experimental import pallas as pl
from jax.experimental.pallas import tpu as pltpu


def _seq_compressor_kernel(x_ref, w_ref, b_ref, o_ref):
    # x_ref: (TM, S)   w_ref: (S, Kout)   b_ref: (1, Kout) f32   o_ref: (TM, Kout)
    acc = jnp.dot(x_ref[...], w_ref[...], preferred_element_type=jnp.float32)
    o_ref[...] = (acc + b_ref[...]).astype(o_ref.dtype)


def _round_up(x, mult):
    return ((x + mult - 1) // mult) * mult


def _vmem_limit_bytes():
    """Generation-aware scoped-VMEM limit."""
    cap = 128 * 1024 * 1024
    get_info = getattr(pltpu, "get_tpu_info", None)
    if get_info is not None:
        try:
            cap = int(getattr(get_info(), "vmem_capacity_bytes", cap))
        except Exception:
            pass
    if cap <= 64 * 1024 * 1024:
        # v7x: 64 MiB per TC -- leave headroom for compiler-internal scratch.
        return 48 * 1024 * 1024
    # v5e / v6e: 128 MiB physical.
    return 96 * 1024 * 1024


def _choose_tile_m(m, seq, k_out, dtype_bytes, sublane):
    """Largest M tile whose lane/sublane-PADDED, double-buffered footprint
    (x tile + out tile + resident weight/bias) fits the generation-aware
    VMEM budget, capped by a ~8 MiB-per-step DMA byte target."""
    budget = _vmem_limit_bytes() - 8 * 1024 * 1024        # headroom for internals

    seq_pad = _round_up(seq, 128)
    k_pad = _round_up(k_out, 128)

    # Resident (but still double-buffered) weight + f32 bias.
    resident = 2 * seq_pad * k_pad * dtype_bytes + 2 * 8 * k_pad * 4

    # Double-buffered x tile (read) + out tile (write), per row.
    per_row = 2 * (seq_pad + k_pad) * dtype_bytes
    tm_budget = max(sublane, (budget - resident) // per_row)

    # Byte-based DMA target (~8 MiB of x per step) instead of a fixed row cap.
    tm_target = max(sublane, (8 * 1024 * 1024) // (seq_pad * dtype_bytes))

    tm = min(tm_budget, tm_target)

    # Clamp to the (sublane-rounded) problem size.
    m_aligned = _round_up(m, sublane)
    tm = min(tm, m_aligned)

    # Never collapse a large slab to a single grid step: keeps software
    # pipelining alive and lets both v7x TensorCores participate.
    if tm >= m_aligned and m * seq * dtype_bytes >= (1 << 20) and m_aligned >= 2 * sublane:
        tm = _round_up((m_aligned + 1) // 2, sublane)

    # Alignment: 256 sublanes for big tiles (MXU friendly on all gens),
    # dtype sublane packing otherwise.
    if tm >= 256:
        tm = (tm // 256) * 256
    else:
        tm = max(sublane, (tm // sublane) * sublane)
    return int(tm)


def sequence_compressor(x, weight, bias, *, tile_m=None):
    """x: (batch, feat, seq); weight: (K, seq); bias: (K,) -> (batch, feat, K)."""
    batch, feat, seq = x.shape
    k = weight.shape[0]
    m = batch * feat

    dtype_bytes = jnp.dtype(x.dtype).itemsize
    sublane = max(8, 32 // max(1, dtype_bytes))            # 8 f32 / 16 bf16 / 32 int8

    # Lane-dense output only when the padded writeback stays negligible vs x.
    lane_dense = (k < 128) and (seq >= 1024)
    k_out = 128 if lane_dense else k

    # One-time tiny transforms of the KB-scale parameters.
    w_sk = weight.T                                         # (S, K) -- MXU-native
    b_vec = bias
    if k_out != k:
        w_sk = jnp.pad(w_sk, ((0, 0), (0, k_out - k)))
        b_vec = jnp.pad(b_vec, (0, k_out - k))
    b2d = b_vec.reshape(1, k_out).astype(jnp.float32)

    if tile_m is None:
        tm = _choose_tile_m(m, seq, k_out, dtype_bytes, sublane)
    else:
        assert tile_m % sublane == 0, (
            f"tile_m must be a multiple of the sublane packing ({sublane}) "
            f"for dtype {x.dtype}")
        tm = int(tile_m)

    num_tiles = pl.cdiv(m, tm)                              # ragged last tile OK
    x2d = x.reshape(m, seq)                                 # view-only, no pad

    cost = pl.CostEstimate(
        flops=2 * m * seq * k_out,
        transcendentals=0,
        bytes_accessed=dtype_bytes * (m * seq + m * k_out + seq * k_out) + 4 * k_out,
    )

    out2d = pl.pallas_call(
        _seq_compressor_kernel,
        out_shape=jax.ShapeDtypeStruct((m, k_out), x.dtype),
        grid_spec=pltpu.PrefetchScalarGridSpec(
            num_scalar_prefetch=0,
            grid=(num_tiles,),
            in_specs=[
                pl.BlockSpec((tm, seq), lambda i: (i, 0)),      # x tile, pipelined over M
                pl.BlockSpec((seq, k_out), lambda i: (0, 0)),   # weight (S,K), resident
                pl.BlockSpec((1, k_out), lambda i: (0, 0)),     # bias (f32), resident
            ],
            out_specs=pl.BlockSpec((tm, k_out), lambda i: (i, 0)),
        ),
        compiler_params=pltpu.CompilerParams(
            dimension_semantics=("parallel",),
            vmem_limit_bytes=_vmem_limit_bytes(),
        ),
        cost_estimate=cost,
    )(x2d, w_sk, b2d)

    if k_out != k:
        out2d = out2d[:, :k]
    return out2d.reshape(batch, feat, k)


def _reference(x, weight, bias):
    batch, feat, seq = x.shape
    k = weight.shape[0]
    return (x.reshape(batch * feat, seq) @ weight.T + bias).reshape(batch, feat, k)


if __name__ == "__main__":
    key = jax.random.PRNGKey(0)

    # --- Test 1: small shapes implied by the module forward (single tile). ---
    batch, feat, seq, K = 2, 4, 16, 8
    kx, kw, kb, k2 = jax.random.split(key, 4)

    x = jax.random.normal(kx, (batch, feat, seq), dtype=jnp.float32)
    bound = 1.0 / (seq ** 0.5)
    weight = jax.random.uniform(kw, (K, seq), minval=-bound, maxval=bound,
                                dtype=jnp.float32)
    bias = jax.random.uniform(kb, (K,), minval=-bound, maxval=bound,
                              dtype=jnp.float32)

    out = jax.block_until_ready(sequence_compressor(x, weight, bias))
    ref = _reference(x, weight, bias)
    assert out.shape == (batch, feat, K)
    assert jnp.allclose(out, ref, atol=1e-5, rtol=1e-5)

    # --- Test 2: multi-tile grid with a RAGGED last M tile (no wrapper pad). ---
    b2, f2, s2, K2 = 2, 150, 128, 32          # m = 300, tile_m=128 -> 3 tiles, last partial
    ka, kb2, kc, k3 = jax.random.split(k2, 4)
    x2 = jax.random.normal(ka, (b2, f2, s2), dtype=jnp.float32)
    bound2 = 1.0 / (s2 ** 0.5)
    w2 = jax.random.uniform(kb2, (K2, s2), minval=-bound2, maxval=bound2,
                            dtype=jnp.float32)
    bi2 = jax.random.uniform(kc, (K2,), minval=-bound2, maxval=bound2,
                             dtype=jnp.float32)

    out2 = jax.block_until_ready(sequence_compressor(x2, w2, bi2, tile_m=128))
    ref2 = _reference(x2, w2, bi2)
    assert out2.shape == (b2, f2, K2)
    assert jnp.allclose(out2, ref2, atol=1e-4, rtol=1e-4)

    # --- Test 3: lane-dense output path (K < 128, seq >= 1024). ---
    b3, f3, s3, K3 = 2, 16, 1024, 8
    kd, ke, kf = jax.random.split(k3, 3)
    x3 = jax.random.normal(kd, (b3, f3, s3), dtype=jnp.float32)
    bound3 = 1.0 / (s3 ** 0.5)
    w3 = jax.random.uniform(ke, (K3, s3), minval=-bound3, maxval=bound3,
                            dtype=jnp.float32)
    bi3 = jax.random.uniform(kf, (K3,), minval=-bound3, maxval=bound3,
                             dtype=jnp.float32)

    out3 = jax.block_until_ready(sequence_compressor(x3, w3, bi3))
    ref3 = _reference(x3, w3, bi3)
    assert out3.shape == (b3, f3, K3)
    assert jnp.allclose(out3, ref3, atol=2e-4, rtol=1e-4)

    print("KERNEL_OK")
</pallas_src>

<mosaic_0001>
module attributes {stable_mosaic.version = 11 : i64} {
  func.func @_seq_compressor_kernel(%arg0: i32, %arg1: memref<8x16xf32, #tpu.memory_space<vmem>>, %arg2: memref<16x8xf32, #tpu.memory_space<vmem>>, %arg3: memref<1x8xf32, #tpu.memory_space<vmem>>, %arg4: memref<8x8xf32, #tpu.memory_space<vmem>>) attributes {dimension_semantics = [#tpu.dimension_semantics<parallel>], iteration_bounds = array<i64: 1>, scalar_prefetch = 0 : i64, scratch_operands = 0 : i64, tpu.core_type = #tpu.core_type<tc>, window_params = [{transform_indices = @transform_0, window_bounds = array<i64: 8, 16>}, {pipeline_mode = #tpu.pipeline_mode<synchronous>, transform_indices = @transform_1, window_bounds = array<i64: 16, 8>}, {pipeline_mode = #tpu.pipeline_mode<synchronous>, transform_indices = @transform_2, window_bounds = array<i64: 1, 8>}, {transform_indices = @transform_3, window_bounds = array<i64: 8, 8>}]} {
    %c0 = arith.constant 0 : index
    %c0_0 = arith.constant 0 : index
    %0 = vector.load %arg1[%c0, %c0_0] : memref<8x16xf32, #tpu.memory_space<vmem>>, vector<8x16xf32>
    %c0_1 = arith.constant 0 : index
    %c0_2 = arith.constant 0 : index
    %1 = vector.load %arg2[%c0_1, %c0_2] : memref<16x8xf32, #tpu.memory_space<vmem>>, vector<16x8xf32>
    %cst = arith.constant dense<0.000000e+00> : vector<8x8xf32>
    %2 = tpu.matmul %0, %1, %cst {dimension_numbers = #tpu.dot_dimension_numbers<[1], [0], [0], [1], [0, 0, 1, 1], [], []>} : vector<8x16xf32>, vector<16x8xf32>, vector<8x8xf32> -> vector<8x8xf32>
    %c0_3 = arith.constant 0 : index
    %c0_4 = arith.constant 0 : index
    %3 = vector.load %arg3[%c0_3, %c0_4] : memref<1x8xf32, #tpu.memory_space<vmem>>, vector<1x8xf32>
    %4 = vector.broadcast %3 : vector<1x8xf32> to vector<8x8xf32>
    %5 = arith.addf %2, %4 : vector<8x8xf32>
    %c0_5 = arith.constant 0 : index
    %c0_6 = arith.constant 0 : index
    %6 = vector.load %arg4[%c0_5, %c0_6] : memref<8x8xf32, #tpu.memory_space<vmem>>, vector<8x8xf32>
    tpu.vector_store %arg4[%c0_5, %c0_6], %5 {strides = array<i32>} : memref<8x8xf32, #tpu.memory_space<vmem>>, vector<8x8xf32>,
    return
  }
  func.func @transform_0(%arg0: i32) -> (i32, i32) {
    %c0_i32 = arith.constant 0 : i32
    %c0_i32_0 = arith.constant 0 : i32
    return %arg0, %c0_i32 : i32, i32
  }
  func.func @transform_1(%arg0: i32) -> (i32, i32) {
    %c0_i32 = arith.constant 0 : i32
    %c0_i32_0 = arith.constant 0 : i32
    %c0_i32_1 = arith.constant 0 : i32
    return %c0_i32, %c0_i32_0 : i32, i32
  }
  func.func @transform_2(%arg0: i32) -> (i32, i32) {
    %c0_i32 = arith.constant 0 : i32
    %c0_i32_0 = arith.constant 0 : i32
    %c0_i32_1 = arith.constant 0 : i32
    return %c0_i32, %c0_i32_0 : i32, i32
  }
  func.func @transform_3(%arg0: i32) -> (i32, i32) {
    %c0_i32 = arith.constant 0 : i32
    %c0_i32_0 = arith.constant 0 : i32
    return %arg0, %c0_i32 : i32, i32
  }
}

</mosaic_0001>

<bundles_post_ra>
// kernel: tpu_custom_call.1
= control target key start
LH: loop header
LB: loop body
LE: loop exit
PB: predicated region body
PF: predicated region fallthrough
CT: control target
= control target key end

     0   :  { %8 = vsyncpa [#allocation3], 0  ;;  %s349_s0 = inlined_call_operand.hbm [shape: f32[8,16], index: 0, kind: input, shape index: {}]   ;;  %s350_s1 = inlined_call_operand.hbm [shape: f32[16,8], index: 1, kind: input, shape index: {}]   ;;  %s351_s2 = inlined_call_operand.hbm [shape: f32[1,8], index: 2, kind: input, shape index: {}]   ;;  %s352_s3 = inlined_call_operand.hbm [shape: f32[8,8], index: 3, kind: output, shape index: {}]  }
   0x1   :  { %9 = vsyncpa [#allocation6], 0 }
   0x2   :  { %10 = vsyncpa [#allocation4], 0  ;;  %s272_s12 = smov [#allocation5]   ;;  %s178_s16 = scalar_lea.hbm %s350_s1, 256 }
   0x3   :  { %s26_s13 = sshll.u32 %s272_s12, 4  ;;  %p179_p0 = scmp.ne.s32.totalorder %s350_s1, %s178_s16  ;;  %s27_s13 = int_to_ptr.vmem [resolvable:$true] %s26_s13 }
   0x4   :  { %p182_p1 = scmp.lt.u32.totalorder %s178_s16, %s350_s1 }
   0x6   :  { %p184_p2 = pnand %p182_p1, %p179_p0 }
   0x8   :  { %187 = shalt.err (!%p184_p2)
}
   0x9   :  { %s188_s21 = scalar_lea.vmem %s27_s13, 256  ;;  %p193_p4 = scmp.lt.s32.totalorder %s27_s13, %s27_s13 }
   0xa   :  { %p189_p3 = scmp.ne.s32.totalorder %s27_s13, %s188_s21  ;;  %p194_p5 = scmp.lt.s32.totalorder %s188_s21, %s188_s21 }
   0xc   :  { %p195_p6 = por %p194_p5, %p193_p4 }
   0xe   :  { %p196_p7 = pnand %p195_p6, %p189_p3 }
  0x10   :  { %199 = shalt.err (!%p196_p7)
}
  0x11   :  { %s273_s22 = smov 128   ;;  %s274_s23 = smov 8  }
  0x12   :  { %32 = dma.hbm_to_vmem [thread:$0]  %s350_s1, 256, %s27_s13, [#allocation6], %s273_s22, %s273_s22, %s274_s23  }
  0x13   :  { %s275_s26 = smov [#allocation2]   ;;  %s276_s28 = smov [#allocation7]  }
  0x14   :  { %s17_s27 = sshll.u32 %s275_s26, 4  ;;  %s39_s29 = sshll.u32 %s276_s28, 4  ;;  %s18_s27 = int_to_ptr.vmem [resolvable:$true] %s17_s27  ;;  %s40_s29 = int_to_ptr.vmem [resolvable:$true] %s39_s29 }
  0x15   :  { %s200_s5 = scalar_lea.hbm %s349_s0, 128 }
  0x16   :  { %p201_p8 = scmp.ne.s32.totalorder %s349_s0, %s200_s5  ;;  %p204_p9 = scmp.lt.u32.totalorder %s200_s5, %s349_s0 }
  0x18   :  { %p206_p10 = pnand %p204_p9, %p201_p8 }
  0x1a   :  { %209 = shalt.err (!%p206_p10)
}
  0x1b   :  { %s210_s1 = scalar_lea.vmem %s18_s27, 128  ;;  %p215_p12 = scmp.lt.s32.totalorder %s18_s27, %s18_s27 }
  0x1c   :  { %p211_p11 = scmp.ne.s32.totalorder %s18_s27, %s210_s1  ;;  %p216_p13 = scmp.lt.s32.totalorder %s210_s1, %s210_s1 }
  0x1e   :  { %p217_p0 = por %p216_p13, %p215_p12 }
  0x20   :  { %p218_p1 = pnand %p217_p0, %p211_p11 }
  0x22   :  { %221 = shalt.err (!%p218_p1)
}
  0x23   :  { %20 = dma.hbm_to_vmem [thread:$0]  %s349_s0, 128, %s18_s27, [#allocation3]  }
  0x24   :  { %s222_s14 = scalar_lea.hbm %s351_s2, 16 }
  0x25   :  { %p223_p2 = scmp.ne.s32.totalorder %s351_s2, %s222_s14  ;;  %p226_p3 = scmp.lt.u32.totalorder %s222_s14, %s351_s2 }
  0x27   :  { %p228_p4 = pnand %p226_p3, %p223_p2 }
  0x29   :  { %231 = shalt.err (!%p228_p4)
}
  0x2a   :  { %s232_s19 = scalar_lea.vmem %s40_s29, 16  ;;  %s236_s20 = scalar_lea.vmem %s40_s29, 32 }
  0x2b   :  { %p233_p5 = scmp.ne.s32.totalorder %s40_s29, %s232_s19  ;;  %p237_p6 = scmp.lt.s32.totalorder %s40_s29, %s40_s29 }
  0x2c   :  { %p238_p7 = scmp.lt.s32.totalorder %s236_s20, %s232_s19 }
  0x2e   :  { %p239_p8 = por %p238_p7, %p237_p6 }
  0x30   :  { %p240_p9 = pnand %p239_p8, %p233_p5 }
  0x32   :  { %243 = shalt.err (!%p240_p9)
}
  0x33   :  { %42 = dma.hbm_to_vmem [thread:$0]  %s351_s2, 16, %s40_s29, [#allocation6]  }
  0x34   :  { %266 = dma.done.wait [#allocation3], 128  }
  0x35   :  { %267 = vsyncadd [#allocation3], 4294967168 }
  0x36   :  { %268 = dma.done.wait [#allocation6], 272  }
  0x37   :  { %269 = vsyncadd [#allocation6], 4294967024  ;;  %v277_v0 = vmov 0.0|0.0   ;;  %vm278_vm0 = vmmov 0   ;;  %v279_v1 = vmov 0.0   ;;  %v53_v2 = vld [vmem:[#allocation5] sm:$0xff] }
  0x38   :  { %166 = vmatprep.subr.bf16.mxu0 %v277_v0  ;;  %163 = vmatprep.mubr.msk.f32.mxu0 %vm278_vm0, %v279_v1  ;;  %v54_v3 = vld [vmem:[#allocation5 + $0x8] sm:$0xff]  ;;  %v52_v5 = vld [vmem:[#allocation2] sm:$0xff]  ;;  %vm62_vm1 = vcmask 130048   ;;  %v154_v6 = vld [vmem:[#allocation7] ss:$0 sm:$0xff]  ;;  %s280_s22 = smov [#allocation8]  }
  0x39   :  { %v167_v4 = vpack.c.bf16 %v54_v3, %v53_v2  ;;  %s144_s23 = sshll.u32 %s280_s22, 4  ;;  %vm136_vm2 = vcmask 64512   ;;  %s145_s23 = int_to_ptr.vmem [resolvable:$true] %s144_s23 }
  0x3a   :  { %s244_s2 = scalar_lea.vmem %s145_s23, 128  ;;  %p249_p11 = scmp.lt.s32.totalorder %s145_s23, %s145_s23 }
  0x3b   :  { %168 = vmatpush3.bf16.msra.mxu0 %v167_v4  ;;  %p245_p10 = scmp.ne.s32.totalorder %s145_s23, %s244_s2  ;;  %p250_p12 = scmp.lt.s32.totalorder %s244_s2, %s244_s2 }
  0x3d   :  { %p251_p13 = por %p250_p12, %p249_p11 }
  0x3e   :  { %164 = vmatmul.mubr.msk.f32.vlgmr.msra.gmra.mrb[0].mxu0 %vm62_vm1, %v52_v5 }
  0x3f   :  { %p252_p0 = pnand %p251_p13, %p245_p10 }
 0x111   :  { %v132_v7 = vpop.f32.mrb[0].mxu0 }
 0x112   :  { %v133_v8 = vadd.f32 %v154_v6, %v132_v7  ;;  %v165_v9 = vpop.f32.mrb[1].mxu0 }
 0x114   :  { %137 = vst.msk [vmem:[#allocation8] sm:$0xff] %vm136_vm2, %v133_v8 }
 0x115   :  { %255 = shalt.err (!%p252_p0)
}
 0x116   :  { %s256_s26 = scalar_lea.hbm %s352_s3, 128 }
 0x117   :  { %p257_p1 = scmp.ne.s32.totalorder %s352_s3, %s256_s26  ;;  %p260_p2 = scmp.lt.u32.totalorder %s256_s26, %s352_s3 }
 0x119   :  { %p262_p3 = pnand %p260_p2, %p257_p1 }
 0x11b   :  { %265 = shalt.err (!%p262_p3)
}
 0x11c   :  { %147 = dma.vmem_to_hbm [thread:$0]  %s145_s23, 128, %s352_s3, [#allocation4]  }
 0x11d   :  { %270 = dma.done.wait [#allocation4], 128  }
 0x11e   :  { %271 = vsyncadd [#allocation4], 4294967168 }
 0x11f   :  { %151 = vsyncpa [#allocation3], 1 }
 0x120   :  { %152 = vsyncpa [#allocation6], 1 }
 0x121   :  { %153 = vsyncpa [#allocation4], 1 }

</bundles_post_ra>
